<compile_context>
chip_gen: v5e
topology: v5e:2x2
jax: 0.10.0
libtpu: 0.0.40
codegen_flags: <defaults>
</compile_context>

<pallas_src>
import jax
import jax.numpy as jnp
from jax.experimental import pallas as pl
from jax.experimental.pallas import tpu as pltpu


def custom_network_kernel(xt_ref, w0m_ref, w1m_ref, w2_ref, b2_ref, ot_ref):
    """One batch tile in (features, batch) layout.

    xt_ref : (d_in, TB)   activations, compute dtype (f32 or bf16)
    w*_ref : masked / cast weights, (out, in), compute dtype
    b2_ref : (d_out, 1)   f32 bias (broadcast over lanes)
    ot_ref : (d_out, TB)  f32 output tile
    """
    cdt = w0m_ref.dtype

    # Layer 0: (32,64) @ (64,TB) -> (32,TB), f32 accumulate on MXU, tanh on EUP.
    h = jnp.dot(w0m_ref[...], xt_ref[...], preferred_element_type=jnp.float32)
    h = jnp.tanh(h)

    # Layer 1: (16,32) @ (32,TB) -> (16,TB).
    h = jnp.dot(w1m_ref[...], h.astype(cdt), preferred_element_type=jnp.float32)
    h = jnp.tanh(h)

    # Final layer with bias, no activation: (8,16) @ (16,TB) -> (8,TB).
    out = jnp.dot(w2_ref[...], h.astype(cdt), preferred_element_type=jnp.float32)
    out = out + b2_ref[...]                      # (8,1) broadcast over lanes
    ot_ref[...] = out.astype(ot_ref.dtype)


def custom_network_forward(x, w0, m0, w1, m1, w2, b2, *,
                           block_b=None, compute_dtype=jnp.bfloat16):
    """Forward pass matching CustomNetwork.forward (torch Linear convention weights)."""
    B, d_in = x.shape
    d_out = w2.shape[0]

    # Lane-dense batch tile: multiple of 128, capped for pipelining granularity.
    if block_b is None:
        block_b = min(1024, 128 * pl.cdiv(B, 128))
    n_blocks = pl.cdiv(B, block_b)
    B_pad = n_blocks * block_b

    # --- wrapper-side layout / constant-folding (hoisted out of the per-tile path) ---
    # Mask + cast weights once (single XLA fusion, amortized over all batch tiles).
    w0m = (w0 * m0).astype(compute_dtype)
    w1m = (w1 * m1).astype(compute_dtype)
    w2c = w2.astype(compute_dtype)
    b2c = jnp.reshape(b2, (d_out, 1)).astype(jnp.float32)

    # Batch-on-lanes activation layout; pad batch to a whole number of tiles.
    xt = x.T.astype(compute_dtype)               # (d_in, B)
    if B_pad != B:
        xt = jnp.pad(xt, ((0, 0), (0, B_pad - B)))

    out_t = pl.pallas_call(
        custom_network_kernel,
        out_shape=jax.ShapeDtypeStruct((d_out, B_pad), jnp.float32),
        grid=(n_blocks,),
        in_specs=[
            # activations: tiled along the (lane) batch axis
            pl.BlockSpec((d_in, block_b), lambda i: (0, i)),
            # weights / bias: constant block index -> stay VMEM-resident across tiles
            pl.BlockSpec(w0m.shape, lambda i: (0, 0)),
            pl.BlockSpec(w1m.shape, lambda i: (0, 0)),
            pl.BlockSpec(w2c.shape, lambda i: (0, 0)),
            pl.BlockSpec((d_out, 1), lambda i: (0, 0)),
        ],
        out_specs=pl.BlockSpec((d_out, block_b), lambda i: (0, i)),
        compiler_params=pltpu.CompilerParams(
            dimension_semantics=("parallel",)),   # megacore sharding on v7x
    )(xt, w0m, w1m, w2c, b2c)

    # Back to torch layout (B, d_out); drop batch padding.
    return out_t.T[:B]


def reference_forward(x, w0, m0, w1, m1, w2, b2):
    h = jnp.tanh(x @ (w0 * m0).T)
    h = jnp.tanh(h @ (w1 * m1).T)
    return h @ w2.T + b2


if __name__ == "__main__":
    key = jax.random.PRNGKey(0)
    k_x, k_w0, k_m0, k_w1, k_m1, k_w2, k_b2 = jax.random.split(key, 7)

    B = 512                              # enough rows for lane-dense 256-wide tiles
    d_in, d_h0, d_h1, d_out = 64, 32, 16, 8

    x = jax.random.normal(k_x, (B, d_in), dtype=jnp.float32)

    # Deterministic "nn.Linear"-style params (uniform in +-1/sqrt(fan_in)).
    def linear_init(k, out_f, in_f):
        bound = 1.0 / jnp.sqrt(jnp.float32(in_f))
        return jax.random.uniform(k, (out_f, in_f), jnp.float32, -bound, bound)

    w0 = linear_init(k_w0, d_h0, d_in)
    w1 = linear_init(k_w1, d_h1, d_h0)
    w2 = linear_init(k_w2, d_out, d_h1)
    b2 = jax.random.uniform(k_b2, (d_out,), jnp.float32,
                            -1.0 / jnp.sqrt(jnp.float32(d_h1)),
                            1.0 / jnp.sqrt(jnp.float32(d_h1)))

    # Binary masks with the same shape as the weights they gate.
    m0 = (jax.random.uniform(k_m0, (d_h0, d_in)) > 0.5).astype(jnp.float32)
    m1 = (jax.random.uniform(k_m1, (d_h1, d_h0)) > 0.5).astype(jnp.float32)

    ref = reference_forward(x, w0, m0, w1, m1, w2, b2)

    # 1) f32-operand path, 2 grid steps (tight tolerance).
    out_f32 = custom_network_forward(x, w0, m0, w1, m1, w2, b2,
                                     block_b=256, compute_dtype=jnp.float32)
    out_f32 = jax.block_until_ready(out_f32)
    assert out_f32.shape == (B, d_out)
    assert jnp.allclose(out_f32, ref, atol=1e-4, rtol=1e-4)

    # 2) bf16 MXU-operand path (default, what v6e/v7x want); f32 accum/tanh/bias.
    out_bf16 = jax.block_until_ready(
        custom_network_forward(x, w0, m0, w1, m1, w2, b2, block_b=256))
    assert out_bf16.shape == (B, d_out)
    assert jnp.allclose(out_bf16, ref, atol=5e-2, rtol=5e-2)

    # 3) Small / ragged batch exercises the padding path (single 128-wide tile).
    out_small = jax.block_until_ready(
        custom_network_forward(x[:8], w0, m0, w1, m1, w2, b2,
                               compute_dtype=jnp.float32))
    assert out_small.shape == (8, d_out)
    assert jnp.allclose(out_small, ref[:8], atol=1e-4, rtol=1e-4)

    print("KERNEL_OK")
</pallas_src>

<mosaic_0001>
module attributes {stable_mosaic.version = 11 : i64} {
  func.func @custom_network_kernel(%arg0: i32, %arg1: memref<64x256xf32, #tpu.memory_space<vmem>>, %arg2: memref<32x64xf32, #tpu.memory_space<vmem>>, %arg3: memref<16x32xf32, #tpu.memory_space<vmem>>, %arg4: memref<8x16xf32, #tpu.memory_space<vmem>>, %arg5: memref<8x1xf32, #tpu.memory_space<vmem>>, %arg6: memref<8x256xf32, #tpu.memory_space<vmem>>) attributes {dimension_semantics = [#tpu.dimension_semantics<parallel>], iteration_bounds = array<i64: 2>, scalar_prefetch = 0 : i64, scratch_operands = 0 : i64, tpu.core_type = #tpu.core_type<tc>, window_params = [{transform_indices = @transform_0, window_bounds = array<i64: 64, 256>}, {pipeline_mode = #tpu.pipeline_mode<synchronous>, transform_indices = @transform_1, window_bounds = array<i64: 32, 64>}, {pipeline_mode = #tpu.pipeline_mode<synchronous>, transform_indices = @transform_2, window_bounds = array<i64: 16, 32>}, {pipeline_mode = #tpu.pipeline_mode<synchronous>, transform_indices = @transform_3, window_bounds = array<i64: 8, 16>}, {pipeline_mode = #tpu.pipeline_mode<synchronous>, transform_indices = @transform_4, window_bounds = array<i64: 8, 1>}, {transform_indices = @transform_5, window_bounds = array<i64: 8, 256>}]} {
    %c0 = arith.constant 0 : index
    %c0_0 = arith.constant 0 : index
    %0 = vector.load %arg2[%c0, %c0_0] : memref<32x64xf32, #tpu.memory_space<vmem>>, vector<32x64xf32>
    %c0_1 = arith.constant 0 : index
    %c0_2 = arith.constant 0 : index
    %1 = vector.load %arg1[%c0_1, %c0_2] : memref<64x256xf32, #tpu.memory_space<vmem>>, vector<64x256xf32>
    %cst = arith.constant dense<0.000000e+00> : vector<32x256xf32>
    %2 = tpu.matmul %0, %1, %cst {dimension_numbers = #tpu.dot_dimension_numbers<[1], [0], [0], [1], [0, 0, 1, 1], [], []>} : vector<32x64xf32>, vector<64x256xf32>, vector<32x256xf32> -> vector<32x256xf32>
    %3 = math.tanh %2 : vector<32x256xf32>
    %c0_3 = arith.constant 0 : index
    %c0_4 = arith.constant 0 : index
    %4 = vector.load %arg3[%c0_3, %c0_4] : memref<16x32xf32, #tpu.memory_space<vmem>>, vector<16x32xf32>
    %cst_5 = arith.constant dense<0.000000e+00> : vector<16x256xf32>
    %5 = tpu.matmul %4, %3, %cst_5 {dimension_numbers = #tpu.dot_dimension_numbers<[1], [0], [0], [1], [0, 0, 1, 1], [], []>} : vector<16x32xf32>, vector<32x256xf32>, vector<16x256xf32> -> vector<16x256xf32>
    %6 = math.tanh %5 : vector<16x256xf32>
    %c0_6 = arith.constant 0 : index
    %c0_7 = arith.constant 0 : index
    %7 = vector.load %arg4[%c0_6, %c0_7] : memref<8x16xf32, #tpu.memory_space<vmem>>, vector<8x16xf32>
    %cst_8 = arith.constant dense<0.000000e+00> : vector<8x256xf32>
    %8 = tpu.matmul %7, %6, %cst_8 {dimension_numbers = #tpu.dot_dimension_numbers<[1], [0], [0], [1], [0, 0, 1, 1], [], []>} : vector<8x16xf32>, vector<16x256xf32>, vector<8x256xf32> -> vector<8x256xf32>
    %c0_9 = arith.constant 0 : index
    %c0_10 = arith.constant 0 : index
    %9 = vector.load %arg5[%c0_9, %c0_10] : memref<8x1xf32, #tpu.memory_space<vmem>>, vector<8x1xf32>
    %10 = vector.broadcast %9 : vector<8x1xf32> to vector<8x256xf32>
    %11 = arith.addf %8, %10 : vector<8x256xf32>
    %c0_11 = arith.constant 0 : index
    %c0_12 = arith.constant 0 : index
    %12 = vector.load %arg6[%c0_11, %c0_12] : memref<8x256xf32, #tpu.memory_space<vmem>>, vector<8x256xf32>
    tpu.vector_store %arg6[%c0_11, %c0_12], %11 {strides = array<i32>} : memref<8x256xf32, #tpu.memory_space<vmem>>, vector<8x256xf32>,
    return
  }
  func.func @transform_0(%arg0: i32) -> (i32, i32) {
    %c0_i32 = arith.constant 0 : i32
    %c0_i32_0 = arith.constant 0 : i32
    return %c0_i32, %arg0 : i32, i32
  }
  func.func @transform_1(%arg0: i32) -> (i32, i32) {
    %c0_i32 = arith.constant 0 : i32
    %c0_i32_0 = arith.constant 0 : i32
    %c0_i32_1 = arith.constant 0 : i32
    return %c0_i32, %c0_i32_0 : i32, i32
  }
  func.func @transform_2(%arg0: i32) -> (i32, i32) {
    %c0_i32 = arith.constant 0 : i32
    %c0_i32_0 = arith.constant 0 : i32
    %c0_i32_1 = arith.constant 0 : i32
    return %c0_i32, %c0_i32_0 : i32, i32
  }
  func.func @transform_3(%arg0: i32) -> (i32, i32) {
    %c0_i32 = arith.constant 0 : i32
    %c0_i32_0 = arith.constant 0 : i32
    %c0_i32_1 = arith.constant 0 : i32
    return %c0_i32, %c0_i32_0 : i32, i32
  }
  func.func @transform_4(%arg0: i32) -> (i32, i32) {
    %c0_i32 = arith.constant 0 : i32
    %c0_i32_0 = arith.constant 0 : i32
    %c0_i32_1 = arith.constant 0 : i32
    return %c0_i32, %c0_i32_0 : i32, i32
  }
  func.func @transform_5(%arg0: i32) -> (i32, i32) {
    %c0_i32 = arith.constant 0 : i32
    %c0_i32_0 = arith.constant 0 : i32
    return %c0_i32, %arg0 : i32, i32
  }
}

</mosaic_0001>

<bundles_post_ra>
// kernel: tpu_custom_call.1
= control target key start
LH: loop header
LB: loop body
LE: loop exit
PB: predicated region body
PF: predicated region fallthrough
CT: control target
= control target key end

     0   :  { %10 = vsyncpa [#allocation3], 0  ;;  %s1095_s0 = inlined_call_operand.hbm [shape: f32[64,512], index: 0, kind: input, shape index: {}]   ;;  %s1096_s1 = inlined_call_operand.hbm [shape: f32[32,64], index: 1, kind: input, shape index: {}]   ;;  %s1097_s2 = inlined_call_operand.hbm [shape: f32[16,32], index: 2, kind: input, shape index: {}]   ;;  %s1098_s3 = inlined_call_operand.vmem [shape: f32[8,16], index: 3, kind: input, shape index: {}]   ;;  %s1099_s4 = inlined_call_operand.vmem [shape: f32[8,1], index: 4, kind: input, shape index: {}]   ;;  %s1100_s5 = inlined_call_operand.hbm [shape: f32[8,512], index: 5, kind: output, shape index: {}]  }
   0x1   :  { %12 = vsyncpa [#allocation3 + $0x1], 0 }
   0x2   :  { %13 = vsyncpa [#allocation6], 0 }
   0x3   :  { %14 = vsyncpa [#allocation4], 0 }
   0x4   :  { %16 = vsyncpa [#allocation4 + $0x1], 0  ;;  %s929_s18 = smov 0   ;;  %s931_s19 = smov 0  }
   0x5   :  { %s933_s20 = smov 0   ;;  %s935_s21 = smov 0  }
   0x6 LB: > { %s950_s22 = sadd.s32 4294967295, %s889_s21   ;;  %s597_s23 = sadd.s32 4294967294, %s889_s21   ;;  %s889_s21 = sphi %s935_s21, %s1110_s21   ;;  %s885_s20 = sphi %s933_s20, %s1109_s20   ;;  %s881_s19 = sphi %s931_s19, %s1108_s19   ;;  %s877_s18 = sphi %s929_s18, %s1107_s18  }
   0x7   : > { %p42_p0 = scmp.ne.s32.totalorder %s881_s19, %s877_s18  ;;  %p43_p1 = scmp.eq.s32.totalorder %s950_s22, 0 }
   0x8   : > { %p150_p2 = scmp.eq.s32.totalorder %s950_s22, 1  ;;  %p156_p3 = scmp.eq.s32.totalorder %s597_s23, 1 }
   0x9   : > { %p959_p4 = por %p43_p1, %p42_p0  ;;  %p598_p5 = scmp.ge.s32.totalorder %s889_s21, 1 }
   0xa   : > { %p964_p6 = por %p156_p3, %p42_p0  ;;  %p163_p7 = scmp.lt.s32.totalorder %s889_s21, 3 }
   0xb   : > { %s174_s28 = sshll.u32 %s1096_s1, 4  ;;  %s891_s30 = smov [#allocation5]   ;;  %s175_s28 = int_to_ptr.hbm [resolvable:$true] %s174_s28 }
   0xc   : > { %p972_p8 = pnand %p598_p5, %p163_p7  ;;  %s176_s6 = sshll.u32 %s891_s30, 4  ;;  %s177_s6 = int_to_ptr.vmem [resolvable:$true] %s176_s6 }
   0xd   : > { %s188_s9 = sshll.u32 %s1097_s2, 4  ;;  %s892_s10 = smov 128   ;;  %s189_s9 = int_to_ptr.hbm [resolvable:$true] %s188_s9 }
   0xe   : > { %p643_p9 = pneg %p972_p8  ;;  %s893_s11 = smov 8  }
   0xf   : > { %s894_s12 = smov [#allocation7]   ;;  %s985_s14 = sadd.s32 1, %s889_s21  }
  0x10   : > { %p644_p10 = pnand %p643_p9, %p43_p1  ;;  %s190_s13 = sshll.u32 %s894_s12, 4  ;;  %s191_s13 = int_to_ptr.vmem [resolvable:$true] %s190_s13 }
  0x11   : > { %s29_s15 = sadd.s32 1, %s885_s20  ;;  %s26_s16 = ssub.s32 %s889_s21, %s985_s14 }
  0x12   : > { %646 = dma.hbm_to_vmem [thread:$0]  (!%p644_p10), %s175_s28, 512, %s177_s6, [#allocation6], %s892_s10, %s892_s10, %s893_s11  }
  0x13   : > { %649 = dma.hbm_to_vmem [thread:$0]  (!%p644_p10), %s189_s9, 256, %s191_s13, [#allocation6], %s892_s10, %s892_s10, %s893_s11  }
  0x14   : > { %p36_p12 = scmp.ne.s32.totalorder %s885_s20, %s881_s19  ;;  %p27_p13 = scmp.eq.s32.totalorder %s26_s16, 0 }
  0x15   : > { %p37_p0 = scmp.eq.s32.totalorder %s889_s21, 0  ;;  %p660_p5 = scmp.lt.s32.totalorder %s889_s21, 2 }
  0x16   : > { %p995_p3 = por %p150_p2, %p36_p12  ;;  %s210_s26 = sand.u32 1, %s885_s20  }
  0x17   : > { %s1001_s23 = scalar_select %p27_p13, %s885_s20, %s29_s15  }
  0x18   : > { %p38_p7 = por %p37_p0, %p36_p12  ;;  %s602_s27 = sshll.u32 %s210_s26, 7 }
  0x19   : > { %s629_s28 = sshll.u32 %s889_s21, 4  ;;  %s214_s8 = scalar_lea.vmem [#allocation2], %s602_s27 }
  0x1a   : > { %s219_s7 = scalar_lea.hbm %s1095_s0, %s629_s28  ;;  %s222_s9 = sshll.u32 %s214_s8, 4  ;;  %s223_s9 = int_to_ptr.vmem [resolvable:$true] %s222_s9 }
  0x1b   : > { %s220_s10 = sshll.u32 %s219_s7, 4  ;;  %p1008_p2 = pnand %p660_p5, %p38_p7  ;;  %s221_s10 = int_to_ptr.hbm [resolvable:$true] %s220_s10 }
  0x1c   : > { %s211_s12 = scalar_lea.sflag [#allocation3], %s210_s26  ;;  %s789_s13 = sshra.s32 %s221_s10, 4  ;;  %s790_s13 = int_to_ptr.hbm [resolvable:$true] %s789_s13 }
  0x1d   : > { %s791_s15 = scalar_lea.hbm %s790_s13, 128  ;;  %p793_p10 = pneg %p1008_p2 }
  0x1e   : > { %p792_p9 = scmp.ne.s32.totalorder %s790_s13, %s791_s15  ;;  %s796_s28 = scalar_lea.hbm %s1095_s0, 256 }
  0x1f   : > { %p797_p0 = scmp.lt.s32.totalorder %s790_s13, %s1095_s0  ;;  %p798_p5 = scmp.lt.s32.totalorder %s796_s28, %s791_s15 }
  0x20   : > { %p794_p12 = pnand %p793_p10, %p792_p9 }
  0x21   : > { %p799_p7 = por %p798_p5, %p797_p0 }
  0x22   : > { %p795_p13 = pneg %p794_p12 }
  0x24   : > { %p800_p11 = pnand %p799_p7, %p795_p13 }
  0x26   : > { %803 = shalt.err (!%p800_p11)
}
  0x27   : > { %s895_s26 = smov 512   ;;  %s896_s7 = smov 256  }
  0x28   : > { %s897_s8 = smov 16   ;;  %234 = sbr.rel (%p972_p8) target bundleno = 516 (0x204), region = 40 }
  0x29   : > { %653 = dma.hbm_to_vmem [thread:$0]  (!%p1008_p2), %s221_s10, 2048, %s223_s9, %s211_s12, %s895_s26, %s896_s7, %s897_s8  }
  0x2a   : > { %s1025_s16 = sand.u32 (!%p972_p8), 1, %s881_s19  }
  0x2b   : > { %s606_s13 = sshll.u32 (!%p972_p8), %s1025_s16, 7  ;;  %s237_s15 = scalar_lea.sflag (!%p972_p8), [#allocation3], %s1025_s16 }
  0x2c   : > { %s1029_s27 = scalar_lea.vmem (!%p972_p8), [#allocation2], %s606_s13 }
  0x2d   : > { %864 = dma.done.wait (%p959_p4), %s237_s15, 2048  }
  0x2e   : > { %866 = vsyncadd (%p959_p4), %s237_s15, 4294965248 }
  0x2f   : > { %868 = dma.done.wait (%p43_p1), [#allocation6], 768  }
  0x30   : > { %870 = vsyncadd (%p43_p1), [#allocation6], 4294966528  ;;  %v298_v0 = vld [vmem:[%s1029_s27 + $0x70] sm:$0xff]  ;;  %v299_v1 = vld [vmem:[%s1029_s27 + $0x78] sm:$0xff]  ;;  %vm300_vm0 = vcmask 523264   ;;  %vm381_vm1 = vcmask 261120  }
  0x31   : > { %v296_v2 = vld [vmem:[%s1029_s27 + $0x60] sm:$0xff]  ;;  %321 = vmatpush.msra.mxu0 %v298_v0  ;;  %350 = vmatpush.msra.mxu1 %v299_v1  ;;  %v297_v3 = vld [vmem:[%s1029_s27 + $0x68] sm:$0xff]  ;;  %v294_v4 = vld [vmem:[%s1029_s27 + $0x50] sm:$0xff]  ;;  %v898_v39 = vmov 0   ;;  %vm445_vm2 = vcmask 130048   ;;  %s609_s11 = sshll.u32 %s1025_s16, 4 }
  0x32   : > { %v295_v5 = vld [vmem:[%s1029_s27 + $0x58] sm:$0xff]  ;;  %v292_v6 = vld [vmem:[%s1029_s27 + $0x40] sm:$0xff]  ;;  %v293_v7 = vld [vmem:[%s1029_s27 + $0x48] sm:$0xff]  ;;  %704 = vset.pattern.permute.xlu0 %v898_v39  ;;  %s630_s12 = sshll.u32 %s950_s22, 4  ;;  %s277_s26 = scalar_lea.vmem [#allocation8], %s609_s11 }
  0x33   : > { %322 = vmatpush.msra.mxu0 %v296_v2  ;;  %351 = vmatpush.msra.mxu1 %v297_v3  ;;  %v290_v8 = vld [vmem:[%s1029_s27 + $0x30] sm:$0xff]  ;;  %v291_v9 = vld [vmem:[%s1029_s27 + $0x38] sm:$0xff]  ;;  %v288_v10 = vld [vmem:[%s1029_s27 + $0x20] sm:$0xff]  ;;  %s503_s6 = scalar_lea.hbm %s1100_s5, %s630_s12  ;;  %s505_s7 = sshll.u32 %s277_s26, 4  ;;  %s506_s7 = int_to_ptr.vmem [resolvable:$true] %s505_s7 }
  0x34   : > { %v289_v11 = vld [vmem:[%s1029_s27 + $0x28] sm:$0xff]  ;;  %v286_v12 = vld [vmem:[%s1029_s27 + $0x10] sm:$0xff]  ;;  %v287_v13 = vld [vmem:[%s1029_s27 + $0x18] sm:$0xff]  ;;  %s507_s8 = sshll.u32 %s503_s6, 4  ;;  %s492_s13 = scalar_lea.sflag [#allocation4], %s1025_s16  ;;  %s508_s8 = int_to_ptr.hbm [resolvable:$true] %s507_s8 }
  0x35   : > { %323 = vmatpush.msra.mxu0 %v294_v4  ;;  %352 = vmatpush.msra.mxu1 %v295_v5  ;;  %v284_v14 = vld [vmem:[%s1029_s27] sm:$0xff]  ;;  %v285_v15 = vld [vmem:[%s1029_s27 + $0x8] sm:$0xff]  ;;  %v282_v18 = vld [vmem:[#allocation5 + $0x10] sm:$0xff]  ;;  %s833_s15 = sshra.s32 %s508_s8, 4  ;;  %s839_s29 = scalar_lea.hbm %s1100_s5, 32  ;;  %s834_s15 = int_to_ptr.hbm [resolvable:$true] %s833_s15 }
  0x36   : > { %v280_v16 = vld [vmem:[#allocation5] sm:$0xff]  ;;  %v281_v17 = vld [vmem:[#allocation5 + $0x8] sm:$0xff]  ;;  %v283_v19 = vld [vmem:[#allocation5 + $0x18] sm:$0xff]  ;;  %s835_s22 = scalar_lea.hbm %s834_s15, 16  ;;  %p840_p11 = scmp.lt.s32.totalorder %s834_s15, %s1100_s5 }
  0x37   : > { %324 = vmatpush.msra.mxu0 %v292_v6  ;;  %353 = vmatpush.msra.mxu1 %v293_v7  ;;  %v379_v34 = vld [vmem:[#allocation7] sm:$0xff]  ;;  %v380_v37 = vld [vmem:[#allocation7 + $0x8] sm:$0xff]  ;;  %p836_p1 = scmp.ne.s32.totalorder %s834_s15, %s835_s22  ;;  %p841_p2 = scmp.lt.s32.totalorder %s839_s29, %s835_s22 }
  0x38   : > { %v439_v38 = vld [vmem:[%s1099_s4] sm:$0xff] }
  0x39   : > { %325 = vmatpush.msra.mxu0 %v290_v8  ;;  %354 = vmatpush.msra.mxu1 %v291_v9  ;;  %v438_v46 = vld [vmem:[%s1098_s3] sm:$0xff]  ;;  %p837_p4 = pnand %p836_p1, %p995_p3  ;;  %p842_p9 = por %p841_p2, %p840_p11 }
  0x3a   : > { %442 = vperm.xlu0 %704, %v439_v38  }
  0x3b   : > { %326 = vmatpush.msra.mxu0 %v288_v10  ;;  %355 = vmatpush.msra.mxu1 %v289_v11  ;;  %p838_p8 = pneg %p837_p4 }
  0x3d   : > { %327 = vmatpush.msra.mxu0 %v286_v12  ;;  %356 = vmatpush.msra.mxu1 %v287_v13  ;;  %p843_p10 = pnand %p842_p9, %p838_p8 }
  0x3f   : > { %328 = vmatpush.msra.mxu0 %v284_v14  ;;  %357 = vmatpush.msra.mxu1 %v285_v15 }
  0x40   : > { %610 = vmatmul.msk.f32.vlgmr.msra.gmra.mxu0 %vm300_vm0, %v280_v16  ;;  %614 = vmatmul.msk.f32.vlgmr.msra.gmra.mxu1 %vm300_vm0, %v280_v16 }
  0x48   : > { %611 = vmatmul.msk.f32.gmra.mxu0 %vm300_vm0, %v281_v17  ;;  %615 = vmatmul.msk.f32.gmra.mxu1 %vm300_vm0, %v281_v17 }
  0x50   : > { %612 = vmatmul.msk.f32.gmra.mxu0 %vm300_vm0, %v282_v18  ;;  %616 = vmatmul.msk.f32.gmra.mxu1 %vm300_vm0, %v282_v18 }
  0x58   : > { %613 = vmatmul.msk.f32.gmra.mxu0 %vm300_vm0, %v283_v19  ;;  %617 = vmatmul.msk.f32.gmra.mxu1 %vm300_vm0, %v283_v19 }
  0xac   : > { %v443_v49 = vpop.permute.xlu0 %442 }
  0xbd   : > { %v330_v20 = vpop.f32.mrf.mxu0  ;;  %v359_v21 = vpop.f32.mrf.mxu1 }
  0xc5   : > { %v333_v22 = vpop.f32.mrf.mxu0  ;;  %v362_v23 = vpop.f32.mrf.mxu1 }
  0xcd   : > { %v336_v24 = vpop.f32.mrf.mxu0  ;;  %v365_v25 = vpop.f32.mrf.mxu1 }
  0xd5   : > { %v339_v26 = vpop.f32.mrf.mxu0  ;;  %v368_v27 = vpop.f32.mrf.mxu1 }
  0xd6   : > { %705 = vtanh.f32 %v339_v26 }
  0xd7   : > { %707 = vtanh.f32 %v368_v27 }
  0xd8   : > { %709 = vtanh.f32 %v336_v24 }
  0xd9   : > { %711 = vtanh.f32 %v365_v25 }
  0xda   : > { %713 = vtanh.f32 %v333_v22 }
  0xdb   : > { %715 = vtanh.f32 %v362_v23 }
  0xdc   : > { %v706_v28 = vpop.eup %705  ;;  %717 = vtanh.f32 %v330_v20 }
  0xdd   : > { %v708_v29 = vpop.eup %707  ;;  %719 = vtanh.f32 %v359_v21  ;;  %400 = vmatpush.msra.mxu2 %v706_v28 }
  0xde   : > { %v710_v30 = vpop.eup %709  ;;  %423 = vmatpush.msra.mxu3 %v708_v29 }
  0xdf   : > { %v712_v31 = vpop.eup %711  ;;  %401 = vmatpush.msra.mxu2 %v710_v30 }
  0xe0   : > { %v714_v32 = vpop.eup %713  ;;  %424 = vmatpush.msra.mxu3 %v712_v31 }
  0xe1   : > { %v716_v33 = vpop.eup %715  ;;  %402 = vmatpush.msra.mxu2 %v714_v32 }
  0xe2   : > { %v718_v35 = vpop.eup %717  ;;  %425 = vmatpush.msra.mxu3 %v716_v33 }
  0xe3   : > { %v720_v36 = vpop.eup %719  ;;  %403 = vmatpush.msra.mxu2 %v718_v35 }
  0xe4   : > { %426 = vmatpush.msra.mxu3 %v720_v36  ;;  %618 = vmatmul.msk.f32.vlgmr.msra.gmra.mxu2 %vm381_vm1, %v379_v34 }
  0xe5   : > { %620 = vmatmul.msk.f32.vlgmr.msra.gmra.mxu3 %vm381_vm1, %v379_v34 }
  0xec   : > { %619 = vmatmul.msk.f32.gmra.mxu2 %vm381_vm1, %v380_v37 }
  0xed   : > { %621 = vmatmul.msk.f32.gmra.mxu3 %vm381_vm1, %v380_v37 }
 0x167   : > { %v405_v40 = vpop.f32.mrf.mxu2 }
 0x168   : > { %v428_v41 = vpop.f32.mrf.mxu3 }
 0x16f   : > { %v408_v42 = vpop.f32.mrf.mxu2 }
 0x170   : > { %721 = vtanh.f32 %v408_v42  ;;  %v431_v43 = vpop.f32.mrf.mxu3 }
 0x171   : > { %723 = vtanh.f32 %v431_v43 }
 0x172   : > { %725 = vtanh.f32 %v405_v40 }
 0x173   : > { %727 = vtanh.f32 %v428_v41 }
 0x176   : > { %v722_v44 = vpop.eup %721 }
 0x177   : > { %v724_v45 = vpop.eup %723  ;;  %463 = vmatpush.msrb.mxu2 %v722_v44 }
 0x178   : > { %v726_v47 = vpop.eup %725  ;;  %483 = vmatpush.msrb.mxu3 %v724_v45 }
 0x179   : > { %v728_v48 = vpop.eup %727  ;;  %464 = vmatpush.msrb.mxu2 %v726_v47 }
 0x17a   : > { %484 = vmatpush.msrb.mxu3 %v728_v48  ;;  %622 = vmatmul.msk.f32.vlgmr.msrb.gmra.mxu2 %vm445_vm2, %v438_v46 }
 0x17b   : > { %623 = vmatmul.msk.f32.vlgmr.msrb.gmra.mxu3 %vm445_vm2, %v438_v46 }
 0x1fd   : > { %v466_v50 = vpop.f32.mrf.mxu2 }
 0x1fe   : > { %v467_v51 = vadd.f32 %v466_v50, %v443_v49  ;;  %v486_v52 = vpop.f32.mrf.mxu3 }
 0x1ff   : > { %v487_v53 = vadd.f32 %v486_v52, %v443_v49 }
 0x200   : > { %489 = vst [vmem:[%s277_s26] sm:$0xff] %v467_v51 }
 0x201   : > { %490 = vst [vmem:[%s277_s26 + $0x8] sm:$0xff] %v487_v53 }
 0x202   : > { %846 = shalt.err (!%p843_p10)
}
 0x203   : > { %641 = dma.vmem_to_hbm [thread:$0]  (%p995_p3), %s506_s7, 256, %s508_s8, %s492_s13  }
 0x204 PF: > { %s519_s16 = sand.u32 1, %s877_s18   ;;  %p1106_p12 = scmp.ge.s32.totalorder %s889_s21, 2 }
 0x205   : > { %s520_s11 = scalar_lea.sflag [#allocation4], %s519_s16 }
 0x206   : > { %p655_p13 = pnand %p1106_p12, %p964_p6 }
 0x208   : > { %p656_p0 = pneg %p655_p13 }
 0x20a   : > { %872 = dma.done.wait (%p656_p0), %s520_s11, 256  }
 0x20b   : > { %874 = vsyncadd (%p656_p0), %s520_s11, 4294967040  ;;  %p19_p5 = scmp.ge.s32.totalorder %s985_s14, 4   ;;  %s1107_s18 = smov %s881_s19 }
 0x20c   : > { %s1108_s19 = smov %s885_s20  ;;  %s1109_s20 = smov %s1001_s23 }
 0x20d   : > { %s1110_s21 = smov %s985_s14  ;;  %21 = sbr.rel (!%p19_p5) target bundleno = 6 (0x6), region = 93 }
 0x212   :  { %526 = vsyncpa [#allocation3], 1 }
 0x213   :  { %528 = vsyncpa [#allocation3 + $0x1], 1 }
 0x214   :  { %529 = vsyncpa [#allocation6], 1 }
 0x215   :  { %530 = vsyncpa [#allocation4], 1 }
 0x216   :  { %532 = vsyncpa [#allocation4 + $0x1], 1 }

</bundles_post_ra>
